<compile_context>
chip_gen: v6e
topology: v6e:2x2x1
jax: 0.10.0
libtpu: 0.0.40
codegen_flags: <defaults>
</compile_context>

<pallas_src>
import functools

import jax
import jax.numpy as jnp
from jax.experimental import pallas as pl
from jax.experimental.pallas import tpu as pltpu

DILATIONS = (1, 4, 7)
KSIZE = 5
PAD_MAX = 2 * max(DILATIONS)        # == get_same_pad(5, 1, 7) == 14


# ---------------------------------------------------------------------------
# Per-generation limits
# ---------------------------------------------------------------------------
def _tpu_vmem_bytes():
    try:
        info = pltpu.get_tpu_info()
        cap = getattr(info, "vmem_capacity_bytes", None)
        if cap:
            return int(cap)
    except Exception:
        pass
    return 64 * 1024 * 1024          # conservative default (v7x per-TC VMEM)


_VMEM_PHYS = _tpu_vmem_bytes()
# Leave ~1/8 headroom for Mosaic internal scratch: ~56 MiB on v7x (64 MiB
# physical), ~112 MiB on v5e/v6e (128 MiB physical).
VMEM_LIMIT = int(_VMEM_PHYS * 7 // 8)
# conv H-tile cap: smaller on 64 MiB chips (v7x), bigger on 128 MiB chips.
CONV_TILE_CAP = 64 if _VMEM_PHYS <= 64 * 1024 * 1024 else 96


def _pick_tile(n, cap, require_mult8=False):
    """Largest divisor of n <= cap, preferring sublane-friendly multiples of 8.

    TODO(synk): for awkward n (e.g. prime T) this degenerates; pad/mask to a
    tile multiple instead.
    """
    cap = max(1, min(n, cap))
    fallback = None
    for t in range(cap, 0, -1):
        if n % t:
            continue
        if t % 8 == 0 or t == n:
            return t
        if fallback is None:
            fallback = t
    if require_mult8:
        return n
    return fallback if fallback is not None else n


# ---------------------------------------------------------------------------
# Layer-1 conv2d (Cin = 1): host im2col + one GEMM + bias + relu kernel
# ---------------------------------------------------------------------------
def _gemm_bias_relu_kernel(x_ref, w_ref, b_ref, o_ref):
    y = jnp.dot(x_ref[...], w_ref[...], preferred_element_type=jnp.float32)
    o_ref[...] = jnp.maximum(y + b_ref[...], 0.0).astype(o_ref.dtype)


def conv2d_first_relu(xs, wm, b, *, tile_cap=512):
    """conv2d(1 -> 128, k=3, pad=1) on (B, T, D) input via im2col + GEMM."""
    B, T, D = xs.shape
    Cout = wm.shape[1]
    xp = jnp.pad(xs, ((0, 0), (1, 1), (1, 1)))
    patches = jnp.stack([xp[:, dh:dh + T, dw:dw + D]
                         for dh in range(3) for dw in range(3)],
                        axis=-1).astype(jnp.bfloat16)          # (B, T, D, 9)
    K = 9
    M = B * T * D
    tm = _pick_tile(M, tile_cap, require_mult8=True)
    y = pl.pallas_call(
        _gemm_bias_relu_kernel,
        out_shape=jax.ShapeDtypeStruct((M, Cout), jnp.bfloat16),
        grid=(M // tm,),
        in_specs=[
            pl.BlockSpec((tm, K), lambda i: (i, 0)),
            pl.BlockSpec((K, Cout), lambda i: (0, 0)),
            pl.BlockSpec((1, Cout), lambda i: (0, 0)),
        ],
        out_specs=pl.BlockSpec((tm, Cout), lambda i: (i, 0)),
        compiler_params=pltpu.CompilerParams(
            dimension_semantics=("parallel",),
            vmem_limit_bytes=VMEM_LIMIT),
    )(patches.reshape(M, K), wm, b)
    return y.reshape(B, T, D, Cout)


# ---------------------------------------------------------------------------
# Generic 2D conv (k=3, pad=1, stride=(1, stride_w)) + bias + relu, NHWC.
# Manual double-buffered halo DMA from unpadded HBM input; conv halo is
# zero-filled in VMEM.  stride_w == 2 is handled by a (W, C) -> (W/2, 2C)
# fold of the unpadded activation on the host (free reshape).
# ---------------------------------------------------------------------------
def _conv3x3_kernel(x_hbm, w_ref, b_ref, o_ref, xbuf, sem, *,
                    tH, Wout, Wb, Cin, stride_w, n_h):
    b = pl.program_id(0)
    i = pl.program_id(1)
    slot = i % 2
    Wf = xbuf.shape[2]
    Cb = xbuf.shape[3]
    Cout = w_ref.shape[1]
    H = n_h * tH

    def tile_copies(ii, sl):
        """DMA descriptors for H tile ii of batch row b into buffer slot sl.

        Body rows land in buffer rows 1..tH, the +/-1 halo rows in rows 0 and
        tH+1, and data columns in 1..Wb (column 0 / Wf-1 stay zero).  Halo
        rows falling outside the image are fetched from a clamped source and
        zeroed after the wait.
        """
        base = ii * tH
        top = jnp.maximum(base - 1, 0)
        bot = jnp.minimum(base + tH, H - 1)
        return (
            pltpu.make_async_copy(x_hbm.at[b, pl.ds(base, tH), :, :],
                                  xbuf.at[sl, pl.ds(1, tH), pl.ds(1, Wb), :],
                                  sem.at[sl, 0]),
            pltpu.make_async_copy(x_hbm.at[b, pl.ds(top, 1), :, :],
                                  xbuf.at[sl, pl.ds(0, 1), pl.ds(1, Wb), :],
                                  sem.at[sl, 1]),
            pltpu.make_async_copy(x_hbm.at[b, pl.ds(bot, 1), :, :],
                                  xbuf.at[sl, pl.ds(tH + 1, 1), pl.ds(1, Wb), :],
                                  sem.at[sl, 2]),
        )

    @pl.when(i == 0)
    def _prime():
        # Zero the W-halo column(s) once per batch row; no DMA ever writes
        # them, so they stay zero afterwards.
        for s in range(2):
            xbuf[s, :, 0:1, :] = jnp.zeros((tH + 2, 1, Cb), xbuf.dtype)
            if stride_w == 1:
                xbuf[s, :, Wf - 1:Wf, :] = jnp.zeros((tH + 2, 1, Cb), xbuf.dtype)
        for cp in tile_copies(i, slot):          # i == 0, slot == 0 here
            cp.start()

    @pl.when(i + 1 < n_h)                        # prefetch next H tile (same b)
    def _prefetch():
        for cp in tile_copies(i + 1, 1 - slot):
            cp.start()

    # Wait with descriptors identical to the ones that were started.
    for cp in tile_copies(i, slot):
        cp.wait()

    # H-halo rows outside the image were fetched from a clamped source row;
    # overwrite them with the zeros conv2d "same" padding expects.
    @pl.when(i == 0)
    def _zero_top():
        xbuf[0, 0:1, :, :] = jnp.zeros((1, Wf, Cb), xbuf.dtype)

    @pl.when(i == n_h - 1)
    def _zero_bot():
        xbuf[(n_h - 1) % 2, tH + 1:tH + 2, :, :] = jnp.zeros((1, Wf, Cb),
                                                             xbuf.dtype)

    # 3x3 conv as accumulating matmuls straight off the halo'd tile
    # (no 9x patch materialization).
    acc = jnp.zeros((tH * Wout, Cout), jnp.float32)
    if stride_w == 1:
        for dh in range(3):
            for dw in range(3):
                xt = xbuf[slot, dh:dh + tH, dw:dw + Wout, :]
                wk = w_ref[(3 * dh + dw) * Cin:(3 * dh + dw + 1) * Cin, :]
                acc = acc + jnp.dot(xt.reshape(tH * Wout, Cin), wk,
                                    preferred_element_type=jnp.float32)
    else:
        C2 = 2 * Cin
        for dh in range(3):
            # dw = 1, 2 fused along K: (even|odd) folded channels of cols 1..Wout
            xt = xbuf[slot, dh:dh + tH, 1:1 + Wout, :]
            wk = w_ref[(3 * dh + 1) * Cin:(3 * dh + 3) * Cin, :]
            acc = acc + jnp.dot(xt.reshape(tH * Wout, C2), wk,
                                preferred_element_type=jnp.float32)
            # dw = 0: odd half of the previous folded column (zero col at j=0)
            xt0 = xbuf[slot, dh:dh + tH, 0:Wout, Cin:C2]
            wk0 = w_ref[3 * dh * Cin:(3 * dh + 1) * Cin, :]
            acc = acc + jnp.dot(xt0.reshape(tH * Wout, Cin), wk0,
                                preferred_element_type=jnp.float32)

    y = jnp.maximum(acc + b_ref[...], 0.0)       # dropout == identity (eval)
    o_ref[0] = y.reshape(tH, Wout, Cout).astype(o_ref.dtype)


def conv2d_3x3_relu(x, wm, b, stride_w):
    """NHWC conv2d, 3x3 kernel, pad 1, stride (1, stride_w), bias, relu."""
    B, H, W, Cin = x.shape
    Cout = wm.shape[1]
    assert wm.shape[0] == 9 * Cin
    if stride_w == 1:
        xin, Wb, Cb, Wf, Wout = x, W, Cin, W + 2, W
    else:
        assert stride_w == 2 and W % 2 == 0, "stride-2 W fold requires even W"
        Wout = W // 2
        xin = x.reshape(B, H, Wout, 2 * Cin)     # free fold: even/odd cols -> channels
        Wb, Cb, Wf = Wout, 2 * Cin, Wout + 1     # only a left zero column is needed
    tH = _pick_tile(H, CONV_TILE_CAP)
    n_h = H // tH
    kernel = functools.partial(_conv3x3_kernel, tH=tH, Wout=Wout, Wb=Wb,
                               Cin=Cin, stride_w=stride_w, n_h=n_h)
    return pl.pallas_call(
        kernel,
        out_shape=jax.ShapeDtypeStruct((B, H, Wout, Cout), jnp.bfloat16),
        grid=(B, n_h),
        in_specs=[
            pl.BlockSpec(memory_space=pl.ANY),                     # manual halo DMA
            pl.BlockSpec((9 * Cin, Cout), lambda bb_, ii: (0, 0)),
            pl.BlockSpec((1, Cout), lambda bb_, ii: (0, 0)),
        ],
        out_specs=pl.BlockSpec((1, tH, Wout, Cout), lambda bb_, ii: (bb_, ii, 0, 0)),
        scratch_shapes=[pltpu.VMEM((2, tH + 2, Wf, Cb), jnp.bfloat16),
                        pltpu.SemaphoreType.DMA((2, 3))],
        compiler_params=pltpu.CompilerParams(
            dimension_semantics=("parallel", "arbitrary"),
            vmem_limit_bytes=VMEM_LIMIT),
    )(xin, wm, b)


# ---------------------------------------------------------------------------
# Dilated-conv1d block 1 (no residual): its own pallas_call so the wide Cm
# input is not resident for the whole residual chain.
# ---------------------------------------------------------------------------
def _block1_kernel(x_ref, w1_ref, w2_ref, w3_ref, b_ref, o_ref, *, T):
    outs = []
    for j, d in enumerate(DILATIONS):
        w = (w1_ref, w2_ref, w3_ref)[j]
        cj = w.shape[2]
        acc = jnp.zeros((T, cj), jnp.float32)
        for k in range(KSIZE):
            off = PAD_MAX - 2 * d + k * d
            acc = acc + jnp.dot(x_ref[0, off:off + T, :], w[k],
                                preferred_element_type=jnp.float32)
        outs.append(acc)
    h0 = jnp.concatenate(outs, axis=-1) + b_ref[...]
    o_ref[0] = jnp.maximum(h0, 0.0).astype(o_ref.dtype)


def block1_call(xpad, block1_params, *, T, cdim):
    B, _, Cm = xpad.shape
    w11, w12, w13, b1 = block1_params
    kernel = functools.partial(_block1_kernel, T=T)
    return pl.pallas_call(
        kernel,
        out_shape=jax.ShapeDtypeStruct((B, T, cdim), jnp.bfloat16),
        grid=(B,),
        in_specs=[
            pl.BlockSpec((1, T + 2 * PAD_MAX, Cm), lambda b: (b, 0, 0)),
            pl.BlockSpec(w11.shape, lambda b: (0, 0, 0)),
            pl.BlockSpec(w12.shape, lambda b: (0, 0, 0)),
            pl.BlockSpec(w13.shape, lambda b: (0, 0, 0)),
            pl.BlockSpec((1, cdim), lambda b: (0, 0)),
        ],
        out_specs=pl.BlockSpec((1, T, cdim), lambda b: (b, 0, 0)),
        compiler_params=pltpu.CompilerParams(
            dimension_semantics=("parallel",),
            vmem_limit_bytes=VMEM_LIMIT),
    )(xpad, w11, w12, w13, b1)


# ---------------------------------------------------------------------------
# 14 residual dilated blocks (weights streamed per block via the grid) with
# the head (fc1 + relu, l_last + tanh) fused into the last-block epilogue.
# ---------------------------------------------------------------------------
def _res_chain_kernel(h0_ref, w1_ref, w2_ref, w3_ref, b_ref,
                      wfc1_ref, bfc1_ref, wlast_ref, blast_ref,
                      o_ref, hpad_ref, *, T, NB):
    blk = pl.program_id(1)

    @pl.when(blk == 0)
    def _():
        hpad_ref[...] = jnp.zeros(hpad_ref.shape, hpad_ref.dtype)
        hpad_ref[PAD_MAX:PAD_MAX + T, :] = h0_ref[0]

    h_old = hpad_ref[PAD_MAX:PAD_MAX + T, :]                    # (T, cdim) bf16
    outs = []
    for j, d in enumerate(DILATIONS):
        w = (w1_ref, w2_ref, w3_ref)[j]
        cj = w.shape[3]
        acc = jnp.zeros((T, cj), jnp.float32)
        for k in range(KSIZE):
            off = PAD_MAX - 2 * d + k * d
            acc = acc + jnp.dot(hpad_ref[off:off + T, :], w[0, k],
                                preferred_element_type=jnp.float32)
        outs.append(acc)
    y = jnp.concatenate(outs, axis=-1) + b_ref[0]
    h_new = jnp.maximum(h_old.astype(jnp.float32) + y, 0.0)
    h_new_bf = h_new.astype(hpad_ref.dtype)
    hpad_ref[PAD_MAX:PAD_MAX + T, :] = h_new_bf

    @pl.when(blk == NB - 1)                                     # fused head
    def _():
        z = jnp.dot(h_new_bf, wfc1_ref[...], preferred_element_type=jnp.float32)
        z = jnp.maximum(z + bfc1_ref[...], 0.0)
        yo = jnp.dot(z.astype(wlast_ref.dtype), wlast_ref[...],
                     preferred_element_type=jnp.float32)
        o_ref[0] = jnp.tanh(yo + blast_ref[...]).astype(o_ref.dtype)


def res_chain_head(h0, blocks, fc1, l_last, *, T):
    B, _, cdim = h0.shape
    wb1, wb2, wb3, bb = blocks
    NB = wb1.shape[0]
    w1, b1 = fc1
    w2, b2 = l_last
    hdim = w2.shape[1]
    kernel = functools.partial(_res_chain_kernel, T=T, NB=NB)
    return pl.pallas_call(
        kernel,
        out_shape=jax.ShapeDtypeStruct((B, T, hdim), jnp.float32),
        grid=(B, NB),
        in_specs=[
            pl.BlockSpec((1, T, cdim), lambda b, k: (b, 0, 0)),
            pl.BlockSpec((1,) + wb1.shape[1:], lambda b, k: (k, 0, 0, 0)),
            pl.BlockSpec((1,) + wb2.shape[1:], lambda b, k: (k, 0, 0, 0)),
            pl.BlockSpec((1,) + wb3.shape[1:], lambda b, k: (k, 0, 0, 0)),
            pl.BlockSpec((1, 1, cdim), lambda b, k: (k, 0, 0)),
            pl.BlockSpec(w1.shape, lambda b, k: (0, 0)),
            pl.BlockSpec(b1.shape, lambda b, k: (0, 0)),
            pl.BlockSpec(w2.shape, lambda b, k: (0, 0)),
            pl.BlockSpec(b2.shape, lambda b, k: (0, 0)),
        ],
        out_specs=pl.BlockSpec((1, T, hdim), lambda b, k: (b, 0, 0)),
        scratch_shapes=[pltpu.VMEM((T + 2 * PAD_MAX, cdim), jnp.bfloat16)],
        compiler_params=pltpu.CompilerParams(
            dimension_semantics=("parallel", "arbitrary"),
            vmem_limit_bytes=VMEM_LIMIT),
    )(h0, wb1, wb2, wb3, bb, w1, b1, w2, b2)


# ---------------------------------------------------------------------------
# Parameters (deterministic synthetic init, shapes per CNN.__init__),
# packed into the layouts the kernels consume.
# ---------------------------------------------------------------------------
def init_params(key, idim, cdim, hdim):
    dim1, dim2 = 128, 256
    assert idim % 8 == 0
    W5 = idim // 8
    cdim_mid = dim2 * W5                         # == int(dim2 * idim / 8)
    c1, c2 = cdim // 2, cdim // 4
    c3 = cdim - c1 - c2
    splits = (c1, c2, c3)

    keys = iter(jax.random.split(key, 512))
    nk = lambda: next(keys)
    nrm = lambda shape, fan: jax.random.normal(nk(), shape, jnp.float32) / (fan ** 0.5)

    params = {}

    # 2D conv layers: torch (Cout, Cin, 3, 3) -> (9*Cin, Cout), rows (dh, dw, ci)
    c2d = []
    for cin, cout in [(1, dim1), (dim1, dim2), (dim2, dim2), (dim2, dim2), (dim2, dim2)]:
        w = nrm((cout, cin, 3, 3), cin * 9)
        b = jax.random.normal(nk(), (cout,), jnp.float32) * 0.01
        wm = jnp.transpose(w, (2, 3, 1, 0)).reshape(9 * cin, cout).astype(jnp.bfloat16)
        c2d.append((wm, b.reshape(1, cout)))
    params["c2d"] = c2d

    def conv1d_t(cj, cin):                       # torch layout (Cout, Cin, K)
        return (nrm((cj, cin, KSIZE), cin * KSIZE),
                jax.random.normal(nk(), (cj,), jnp.float32) * 0.01)

    # block 1: fold the channel-major (c*W5 + w) -> W-major (w*C5 + c) input
    # permutation of the torch reference into the weight rows.
    w1_list, b1_list = [], []
    for cj in splits:
        wt, bt = conv1d_t(cj, cdim_mid)
        wk = jnp.transpose(wt, (2, 1, 0))                    # (K, Cm, cj)
        wk = wk.reshape(KSIZE, dim2, W5, cj)
        wk = jnp.transpose(wk, (0, 2, 1, 3)).reshape(KSIZE, cdim_mid, cj)
        w1_list.append(wk.astype(jnp.bfloat16))
        b1_list.append(bt)
    params["block1"] = (w1_list[0], w1_list[1], w1_list[2],
                        jnp.concatenate(b1_list).reshape(1, cdim))

    # residual blocks 2..15: per-branch per-tap weights, stacked over blocks
    # as (NB, K, cdim, cj) so they can be streamed per block via the grid.
    wa, wbl, wc, bbs = [], [], [], []
    for _ in range(14):
        ws, bs = [], []
        for cj in splits:
            wt, bt = conv1d_t(cj, cdim)
            ws.append(jnp.transpose(wt, (2, 1, 0)).astype(jnp.bfloat16))  # (K, cdim, cj)
            bs.append(bt)
        wa.append(ws[0]); wbl.append(ws[1]); wc.append(ws[2])
        bbs.append(jnp.concatenate(bs).reshape(1, cdim))
    params["blocks"] = (jnp.stack(wa), jnp.stack(wbl), jnp.stack(wc), jnp.stack(bbs))

    # head (torch Linear: y = x @ W.T + b)
    w_fc1 = nrm((cdim, cdim), cdim)
    b_fc1 = jax.random.normal(nk(), (cdim,), jnp.float32) * 0.01
    w_last = nrm((hdim, cdim), cdim)
    b_last = jax.random.normal(nk(), (hdim,), jnp.float32) * 0.01
    params["fc1"] = (w_fc1.T.astype(jnp.bfloat16), b_fc1.reshape(1, cdim))
    params["l_last"] = (w_last.T.astype(jnp.bfloat16), b_last.reshape(1, hdim))
    return params


# ---------------------------------------------------------------------------
# Forward (matches CNN.forward, eval mode)
# ---------------------------------------------------------------------------
def cnn_forward(params, xs_pad, ilens):
    B, T, D = xs_pad.shape
    assert D % 8 == 0, "stride-2 W folds require idim % 8 == 0"

    # conv2d stage (torch NCHW (B,1,T,D) <-> NHWC (B,T,D,1) here).
    x = conv2d_first_relu(xs_pad, *params["c2d"][0])          # (B, T, D, 128)
    for (wm, b), sw in zip(params["c2d"][1:], (1, 2, 2, 2)):
        x = conv2d_3x3_relu(x, wm, b, stride_w=sw)

    # W-major flatten (free); the channel-major permutation of the torch
    # reference is folded into block-1's weight rows.
    Bq, Tq, W5, C5 = x.shape
    x = x.reshape(Bq, Tq, W5 * C5)

    # one halo pad for the whole 15-block dilated chain
    xpad = jnp.pad(x, ((0, 0), (PAD_MAX, PAD_MAX), (0, 0)))
    cdim = params["block1"][3].shape[1]
    h0 = block1_call(xpad, params["block1"], T=Tq, cdim=cdim)

    # 14 residual dilated blocks (streamed weights) + fused fc1/relu, l_last/tanh
    out = res_chain_head(h0, params["blocks"], params["fc1"], params["l_last"], T=Tq)
    return out, ilens, None


if __name__ == "__main__":
    key = jax.random.PRNGKey(0)
    kp, kx = jax.random.split(key)

    B, T, idim, cdim, hdim = 2, 8, 16, 32, 32
    params = init_params(kp, idim, cdim, hdim)
    xs_pad = jax.random.normal(kx, (B, T, idim), jnp.float32)
    ilens = jnp.full((B,), T, jnp.int32)

    out, olens, states = cnn_forward(params, xs_pad, ilens)
    jax.block_until_ready(out)
    assert out.shape == (B, T, hdim), out.shape
    assert bool(jnp.all(jnp.isfinite(out)))
    print("KERNEL_OK")
</pallas_src>

<mosaic_0001>
module attributes {stable_mosaic.version = 11 : i64} {
  func.func @_gemm_bias_relu_kernel(%arg0: i32, %arg1: memref<256x9xbf16, #tpu.memory_space<vmem>>, %arg2: memref<9x128xbf16, #tpu.memory_space<vmem>>, %arg3: memref<1x128xf32, #tpu.memory_space<vmem>>, %arg4: memref<256x128xbf16, #tpu.memory_space<vmem>>) attributes {dimension_semantics = [#tpu.dimension_semantics<parallel>], iteration_bounds = array<i64: 1>, scalar_prefetch = 0 : i64, scratch_operands = 0 : i64, tpu.core_type = #tpu.core_type<tc>, window_params = [{transform_indices = @transform_0, window_bounds = array<i64: 256, 9>}, {pipeline_mode = #tpu.pipeline_mode<synchronous>, transform_indices = @transform_1, window_bounds = array<i64: 9, 128>}, {pipeline_mode = #tpu.pipeline_mode<synchronous>, transform_indices = @transform_2, window_bounds = array<i64: 1, 128>}, {transform_indices = @transform_3, window_bounds = array<i64: 256, 128>}]} {
    %c0 = arith.constant 0 : index
    %c0_0 = arith.constant 0 : index
    %0 = vector.load %arg1[%c0, %c0_0] : memref<256x9xbf16, #tpu.memory_space<vmem>>, vector<256x9xbf16>
    %c0_1 = arith.constant 0 : index
    %c0_2 = arith.constant 0 : index
    %1 = vector.load %arg2[%c0_1, %c0_2] : memref<9x128xbf16, #tpu.memory_space<vmem>>, vector<9x128xbf16>
    %cst = arith.constant dense<0.000000e+00> : vector<256x128xf32>
    %2 = tpu.matmul %0, %1, %cst {dimension_numbers = #tpu.dot_dimension_numbers<[1], [0], [0], [1], [0, 0, 1, 1], [], []>} : vector<256x9xbf16>, vector<9x128xbf16>, vector<256x128xf32> -> vector<256x128xf32>
    %c0_3 = arith.constant 0 : index
    %c0_4 = arith.constant 0 : index
    %3 = vector.load %arg3[%c0_3, %c0_4] : memref<1x128xf32, #tpu.memory_space<vmem>>, vector<1x128xf32>
    %4 = vector.broadcast %3 : vector<1x128xf32> to vector<256x128xf32>
    %5 = arith.addf %2, %4 : vector<256x128xf32>
    %cst_5 = arith.constant 0.000000e+00 : f32
    %6 = vector.broadcast %cst_5 : f32 to vector<256x128xf32>
    %7 = arith.maximumf %5, %6 : vector<256x128xf32>
    %8 = arith.truncf %7 : vector<256x128xf32> to vector<256x128xbf16>
    %c0_6 = arith.constant 0 : index
    %c0_7 = arith.constant 0 : index
    %9 = vector.load %arg4[%c0_6, %c0_7] : memref<256x128xbf16, #tpu.memory_space<vmem>>, vector<256x128xbf16>
    tpu.vector_store %arg4[%c0_6, %c0_7], %8 {strides = array<i32>} : memref<256x128xbf16, #tpu.memory_space<vmem>>, vector<256x128xbf16>,
    return
  }
  func.func @transform_0(%arg0: i32) -> (i32, i32) {
    %c0_i32 = arith.constant 0 : i32
    %c0_i32_0 = arith.constant 0 : i32
    return %arg0, %c0_i32 : i32, i32
  }
  func.func @transform_1(%arg0: i32) -> (i32, i32) {
    %c0_i32 = arith.constant 0 : i32
    %c0_i32_0 = arith.constant 0 : i32
    %c0_i32_1 = arith.constant 0 : i32
    return %c0_i32, %c0_i32_0 : i32, i32
  }
  func.func @transform_2(%arg0: i32) -> (i32, i32) {
    %c0_i32 = arith.constant 0 : i32
    %c0_i32_0 = arith.constant 0 : i32
    %c0_i32_1 = arith.constant 0 : i32
    return %c0_i32, %c0_i32_0 : i32, i32
  }
  func.func @transform_3(%arg0: i32) -> (i32, i32) {
    %c0_i32 = arith.constant 0 : i32
    %c0_i32_0 = arith.constant 0 : i32
    return %arg0, %c0_i32 : i32, i32
  }
}

</mosaic_0001>

<bundles_post_ra>
// kernel: tpu_custom_call.1
= control target key start
LH: loop header
LB: loop body
LE: loop exit
PB: predicated region body
PF: predicated region fallthrough
CT: control target
= control target key end

     0   :  { %vm191_vm0 = vcmask 1043456   ;;  %vm192_vm1 = vcmask 1044480   ;;  %v856_v2 = vmov 65535   ;;  %vm142_vm2 = vcmask 72704   ;;  %s987_s0 = inlined_call_operand.vmem [shape: bf16[256,9], index: 0, kind: input, shape index: {}]   ;;  %s988_s1 = inlined_call_operand.vmem [shape: bf16[9,128], index: 1, kind: input, shape index: {}]   ;;  %s989_s2 = inlined_call_operand.vmem [shape: f32[1,128], index: 2, kind: input, shape index: {}]   ;;  %s990_s3 = inlined_call_operand.hbm [shape: bf16[256,128], index: 3, kind: output, shape index: {}]  }
   0x1   :  { %v817_v0 = vld [vmem:[%s988_s1] sm:$0x1f]   ;;  %v193_v3 = vsel %vm191_vm0, 4294967295, %v856_v2  ;;  %v820_v7 = vld [vmem:[%s987_s0 + $0x8] sm:$0xff]   ;;  %v822_v9 = vld [vmem:[%s987_s0 + $0x10] sm:$0xff]  }
   0x2   :  { %v818_v1 = vld [vmem:[%s987_s0] sm:$0xff]   ;;  %v194_v4 = vsel %vm192_vm1, %v193_v3, 0  ;;  %v821_v8 = vld [vmem:[%s987_s0 + $0x48] sm:$0xff]   ;;  %v823_v10 = vld [vmem:[%s987_s0 + $0x50] sm:$0xff]  }
   0x3   :  { %779 = vmatprep.mubr.msk.bf16.mxu0 %vm142_vm2, %v818_v1  ;;  %v819_v5 = vld [vmem:[%s987_s0 + $0x40] sm:$0xff]   ;;  %v196_v6 = vand.u32 %v817_v0, %v194_v4  ;;  %v824_v11 = vld [vmem:[%s987_s0 + $0x18] sm:$0xff]  }
   0x4   :  { %795 = vmatprep.mubr.msk.bf16.mxu1 %vm142_vm2, %v819_v5  ;;  %v825_v12 = vld [vmem:[%s987_s0 + $0x58] sm:$0xff]   ;;  %v826_v13 = vld [vmem:[%s987_s0 + $0x20] sm:$0xff]  }
   0x5   :  { %777 = vmatprep.subr.bf16.mxu0 %v196_v6  ;;  %811 = vmatprep.subr.bf16.mxu1 %v196_v6  ;;  %v827_v14 = vld [vmem:[%s987_s0 + $0x60] sm:$0xff]  }
   0x6   :  { %778 = vmatpush3.bf16.msra.mxu0 %v196_v6  ;;  %812 = vmatpush3.bf16.msra.mxu1 %v196_v6 }
   0x9   :  { %780 = vmatmul.mubr.msk.bf16.vlgmr.msra.gmra.mxu0 %vm142_vm2, %v820_v7  ;;  %796 = vmatmul.mubr.msk.bf16.vlgmr.msra.gmra.mxu1 %vm142_vm2, %v821_v8 }
   0xa   :  { %783 = vmatprep.mubr.msk.bf16.mxu0 %vm142_vm2, %v822_v9  ;;  %799 = vmatprep.mubr.msk.bf16.mxu1 %vm142_vm2, %v823_v10 }
   0xb   :  { %8 = vsyncpa [#allocation3], 0  ;;  %v828_v15 = vld [vmem:[%s987_s0 + $0x28] sm:$0xff]   ;;  %v830_v17 = vld [vmem:[%s987_s0 + $0x30] sm:$0xff]  }
   0xc   :  { %v829_v16 = vld [vmem:[%s987_s0 + $0x68] sm:$0xff]   ;;  %v831_v18 = vld [vmem:[%s987_s0 + $0x70] sm:$0xff]   ;;  %v832_v19 = vld [vmem:[%s987_s0 + $0x38] sm:$0xff]  }
   0xd   :  { %v833_v20 = vld [vmem:[%s987_s0 + $0x78] sm:$0xff]   ;;  %v950_v21 = vld [vmem:[%s989_s2] ss:$0 sm:$0xff]  ;;  %s857_s0 = smov [#allocation2]  }
   0xe   :  { %s556_s2 = sshll.u32 %s857_s0, 4  ;;  %s557_s2 = int_to_ptr.vmem [resolvable:$true] %s556_s2 }
   0xf   :  { %s834_s1 = scalar_lea.vmem %s557_s2, 2048  ;;  %p839_p1 = scmp.lt.s32.totalorder %s557_s2, %s557_s2 }
  0x10   :  { %p835_p0 = scmp.ne.s32.totalorder %s557_s2, %s834_s1  ;;  %p840_p2 = scmp.lt.s32.totalorder %s834_s1, %s834_s1 }
  0x11   :  { %784 = vmatmul.mubr.msk.bf16.gmra.mxu0 %vm142_vm2, %v824_v11  ;;  %800 = vmatmul.mubr.msk.bf16.gmra.mxu1 %vm142_vm2, %v825_v12 }
  0x12   :  { %787 = vmatprep.mubr.msk.bf16.mxu0 %vm142_vm2, %v826_v13  ;;  %803 = vmatprep.mubr.msk.bf16.mxu1 %vm142_vm2, %v827_v14  ;;  %p841_p3 = por %p840_p2, %p839_p1 }
  0x14   :  { %p842_p4 = pnand %p841_p3, %p835_p0 }
  0x19   :  { %788 = vmatmul.mubr.msk.bf16.gmra.mxu0 %vm142_vm2, %v828_v15  ;;  %804 = vmatmul.mubr.msk.bf16.gmra.mxu1 %vm142_vm2, %v829_v16 }
  0x1a   :  { %791 = vmatprep.mubr.msk.bf16.mxu0 %vm142_vm2, %v830_v17  ;;  %807 = vmatprep.mubr.msk.bf16.mxu1 %vm142_vm2, %v831_v18 }
  0x21   :  { %792 = vmatmul.mubr.msk.bf16.gmra.mxu0 %vm142_vm2, %v832_v19  ;;  %808 = vmatmul.mubr.msk.bf16.gmra.mxu1 %vm142_vm2, %v833_v20 }
  0xc9   :  { %v781_v22 = vpop.f32.mrf.mxu0  ;;  %v797_v23 = vpop.f32.mrf.mxu1 }
  0xca   :  { %v241_v24 = vadd.f32 %v781_v22, %v950_v21  ;;  %v305_v25 = vadd.f32 %v797_v23, %v950_v21 }
  0xcb   :  { %v232_v26 = vpop.f32.mrf.mxu0  ;;  %v296_v27 = vpop.f32.mrf.mxu1 }
  0xcc   :  { %v233_v28 = vadd.f32 %v950_v21, %v232_v26  ;;  %v297_v29 = vadd.f32 %v950_v21, %v296_v27  ;;  %v361_v34 = vmax.f32 %v241_v24, 0.0  ;;  %v377_v35 = vmax.f32 %v305_v25, 0.0 }
  0xcd   :  { %v782_v30 = vpop.f32.mrf.mxu0  ;;  %v798_v31 = vpop.f32.mrf.mxu1 }
  0xce   :  { %v244_v32 = vadd.f32 %v782_v30, %v950_v21  ;;  %v308_v33 = vadd.f32 %v798_v31, %v950_v21  ;;  %v359_v42 = vmax.f32 %v233_v28, 0.0  ;;  %v375_v43 = vmax.f32 %v297_v29, 0.0 }
  0xcf   :  { %v235_v36 = vpop.f32.mrf.mxu0  ;;  %v299_v37 = vpop.f32.mrf.mxu1 }
  0xd0   :  { %v362_v38 = vmax.f32 %v244_v32, 0.0  ;;  %v378_v39 = vmax.f32 %v308_v33, 0.0  ;;  %v236_v40 = vadd.f32 %v950_v21, %v235_v36  ;;  %v300_v41 = vadd.f32 %v950_v21, %v299_v37 }
  0xd1   :  { %v785_v44 = vpop.f32.mrf.mxu0  ;;  %v801_v45 = vpop.f32.mrf.mxu1 }
  0xd2   :  { %v673_v46 = vpack.c.bf16 %v362_v38, %v361_v34  ;;  %v713_v47 = vpack.c.bf16 %v378_v39, %v377_v35  ;;  %v360_v48 = vmax.f32 %v236_v40, 0.0  ;;  %v376_v49 = vmax.f32 %v300_v41, 0.0 }
  0xd3   :  { %v257_v50 = vadd.f32 %v785_v44, %v950_v21  ;;  %v321_v51 = vadd.f32 %v801_v45, %v950_v21  ;;  %v248_v52 = vpop.f32.mrf.mxu0  ;;  %v312_v53 = vpop.f32.mrf.mxu1 }
  0xd4   :  { %745 = vst [vmem:[#allocation2 + $0x8] sm:$0xff] %v673_v46   ;;  %753 = vst [vmem:[#allocation2 + $0x48] sm:$0xff] %v713_v47   ;;  %v668_v54 = vpack.c.bf16 %v360_v48, %v359_v42  ;;  %v708_v55 = vpack.c.bf16 %v376_v49, %v375_v43  ;;  %v249_v56 = vadd.f32 %v950_v21, %v248_v52 }
  0xd5   :  { %v313_v57 = vadd.f32 %v950_v21, %v312_v53  ;;  %v786_v58 = vpop.f32.mrf.mxu0  ;;  %v802_v59 = vpop.f32.mrf.mxu1  ;;  %v365_v62 = vmax.f32 %v257_v50, 0.0  ;;  %v381_v63 = vmax.f32 %v321_v51, 0.0 }
  0xd6   :  { %669 = vst [vmem:[#allocation2] sm:$0xff] %v668_v54   ;;  %752 = vst [vmem:[#allocation2 + $0x40] sm:$0xff] %v708_v55   ;;  %v260_v60 = vadd.f32 %v786_v58, %v950_v21  ;;  %v324_v61 = vadd.f32 %v802_v59, %v950_v21  ;;  %v363_v6 = vmax.f32 %v249_v56, 0.0 }
  0xd7   :  { %v251_v0 = vpop.f32.mrf.mxu0  ;;  %v315_v1 = vpop.f32.mrf.mxu1  ;;  %v379_v7 = vmax.f32 %v313_v57, 0.0 }
  0xd8   :  { %v366_v2 = vmax.f32 %v260_v60, 0.0  ;;  %v382_v3 = vmax.f32 %v324_v61, 0.0  ;;  %v252_v4 = vadd.f32 %v950_v21, %v251_v0  ;;  %v316_v5 = vadd.f32 %v950_v21, %v315_v1 }
  0xd9   :  { %v789_v8 = vpop.f32.mrf.mxu0  ;;  %v805_v9 = vpop.f32.mrf.mxu1 }
  0xda   :  { %v683_v10 = vpack.c.bf16 %v366_v2, %v365_v62  ;;  %v723_v11 = vpack.c.bf16 %v382_v3, %v381_v63  ;;  %v364_v12 = vmax.f32 %v252_v4, 0.0  ;;  %v380_v13 = vmax.f32 %v316_v5, 0.0 }
  0xdb   :  { %v273_v14 = vadd.f32 %v789_v8, %v950_v21  ;;  %v337_v15 = vadd.f32 %v805_v9, %v950_v21  ;;  %v264_v16 = vpop.f32.mrf.mxu0  ;;  %v328_v17 = vpop.f32.mrf.mxu1 }
  0xdc   :  { %747 = vst [vmem:[#allocation2 + $0x18] sm:$0xff] %v683_v10   ;;  %755 = vst [vmem:[#allocation2 + $0x58] sm:$0xff] %v723_v11   ;;  %v678_v18 = vpack.c.bf16 %v364_v12, %v363_v6  ;;  %v718_v19 = vpack.c.bf16 %v380_v13, %v379_v7  ;;  %v265_v20 = vadd.f32 %v950_v21, %v264_v16 }
  0xdd   :  { %v329_v22 = vadd.f32 %v950_v21, %v328_v17  ;;  %v790_v23 = vpop.f32.mrf.mxu0  ;;  %v806_v24 = vpop.f32.mrf.mxu1  ;;  %v369_v27 = vmax.f32 %v273_v14, 0.0  ;;  %v385_v28 = vmax.f32 %v337_v15, 0.0 }
  0xde   :  { %746 = vst [vmem:[#allocation2 + $0x10] sm:$0xff] %v678_v18   ;;  %754 = vst [vmem:[#allocation2 + $0x50] sm:$0xff] %v718_v19   ;;  %v276_v25 = vadd.f32 %v790_v23, %v950_v21  ;;  %v340_v26 = vadd.f32 %v806_v24, %v950_v21  ;;  %v367_v35 = vmax.f32 %v265_v20, 0.0 }
  0xdf   :  { %v267_v29 = vpop.f32.mrf.mxu0  ;;  %v331_v30 = vpop.f32.mrf.mxu1  ;;  %v383_v36 = vmax.f32 %v329_v22, 0.0 }
  0xe0   :  { %v370_v31 = vmax.f32 %v276_v25, 0.0  ;;  %v386_v32 = vmax.f32 %v340_v26, 0.0  ;;  %v268_v33 = vadd.f32 %v950_v21, %v267_v29  ;;  %v332_v34 = vadd.f32 %v950_v21, %v331_v30 }
  0xe1   :  { %v793_v37 = vpop.f32.mrf.mxu0  ;;  %v809_v38 = vpop.f32.mrf.mxu1 }
  0xe2   :  { %v693_v39 = vpack.c.bf16 %v370_v31, %v369_v27  ;;  %v733_v40 = vpack.c.bf16 %v386_v32, %v385_v28  ;;  %v368_v41 = vmax.f32 %v268_v33, 0.0  ;;  %v384_v42 = vmax.f32 %v332_v34, 0.0 }
  0xe3   :  { %v289_v43 = vadd.f32 %v793_v37, %v950_v21  ;;  %v353_v44 = vadd.f32 %v809_v38, %v950_v21  ;;  %v280_v45 = vpop.f32.mrf.mxu0  ;;  %v344_v46 = vpop.f32.mrf.mxu1 }
  0xe4   :  { %749 = vst [vmem:[#allocation2 + $0x28] sm:$0xff] %v693_v39   ;;  %757 = vst [vmem:[#allocation2 + $0x68] sm:$0xff] %v733_v40   ;;  %v688_v47 = vpack.c.bf16 %v368_v41, %v367_v35  ;;  %v728_v48 = vpack.c.bf16 %v384_v42, %v383_v36  ;;  %v281_v49 = vadd.f32 %v950_v21, %v280_v45 }
  0xe5   :  { %v345_v50 = vadd.f32 %v950_v21, %v344_v46  ;;  %v794_v51 = vpop.f32.mrf.mxu0  ;;  %v810_v52 = vpop.f32.mrf.mxu1  ;;  %v373_v55 = vmax.f32 %v289_v43, 0.0  ;;  %v389_v56 = vmax.f32 %v353_v44, 0.0 }
  0xe6   :  { %748 = vst [vmem:[#allocation2 + $0x20] sm:$0xff] %v688_v47   ;;  %756 = vst [vmem:[#allocation2 + $0x60] sm:$0xff] %v728_v48   ;;  %v292_v53 = vadd.f32 %v794_v51, %v950_v21  ;;  %v356_v54 = vadd.f32 %v810_v52, %v950_v21  ;;  %v371_v63 = vmax.f32 %v281_v49, 0.0 }
  0xe7   :  { %v283_v57 = vpop.f32.mrf.mxu0  ;;  %v347_v58 = vpop.f32.mrf.mxu1  ;;  %v387_v0 = vmax.f32 %v345_v50, 0.0 }
  0xe8   :  { %v374_v59 = vmax.f32 %v292_v53, 0.0  ;;  %v390_v60 = vmax.f32 %v356_v54, 0.0  ;;  %v284_v61 = vadd.f32 %v950_v21, %v283_v57  ;;  %v348_v62 = vadd.f32 %v950_v21, %v347_v58 }
  0xea   :  { %v703_v1 = vpack.c.bf16 %v374_v59, %v373_v55  ;;  %v743_v2 = vpack.c.bf16 %v390_v60, %v389_v56  ;;  %v372_v3 = vmax.f32 %v284_v61, 0.0  ;;  %v388_v4 = vmax.f32 %v348_v62, 0.0 }
  0xec   :  { %751 = vst [vmem:[#allocation2 + $0x38] sm:$0xff] %v703_v1   ;;  %759 = vst [vmem:[#allocation2 + $0x78] sm:$0xff] %v743_v2   ;;  %v698_v5 = vpack.c.bf16 %v372_v3, %v371_v63  ;;  %v738_v6 = vpack.c.bf16 %v388_v4, %v387_v0 }
  0xee   :  { %750 = vst [vmem:[#allocation2 + $0x30] sm:$0xff] %v698_v5   ;;  %758 = vst [vmem:[#allocation2 + $0x70] sm:$0xff] %v738_v6  }
  0xef   :  { %845 = shalt.err (!%p842_p4)
}
  0xf0   :  { %s858_s20 = smov 64   ;;  %s859_s21 = smov 4  }
  0xf1   :  { %562 = dma.vmem_to_hbm [thread:$0]  %s557_s2, 2048, %s990_s3, [#allocation3], %s858_s20, %s858_s20, %s859_s21  }
  0xf2   :  { %854 = dma.done.wait [#allocation3], 2048  }
  0xf3   :  { %855 = vsyncadd [#allocation3], 4294965248 }
  0xf4   :  { %566 = vsyncpa [#allocation3], 1 }

</bundles_post_ra>
